<compile_context>
chip_gen: v5e
topology: v5e:2x2
jax: 0.10.0
libtpu: 0.0.40
codegen_flags: <defaults>
</compile_context>

<pallas_src>
import jax
import jax.numpy as jnp
from jax.experimental import pallas as pl
from jax.experimental.pallas import tpu as pltpu


def mlp_kernel(x_ref, w1_ref, b1_ref, w23_ref, b23_ref, o_ref):
    # Layer 1 (K=3 contraction): 3 broadcast VPU FMAs are cheaper than a
    # 3-wide MXU matmul (which would pad K to 128/256 and waste an MXU push).
    x = x_ref[...]                      # (TB, 3)  f32
    w1 = w1_ref[...]                    # (3, 256) f32
    h1 = (x[:, 0:1] * w1[0:1, :]
          + x[:, 1:2] * w1[1:2, :]
          + x[:, 2:3] * w1[2:3, :])
    h1 = jnp.maximum(h1 + b1_ref[...], 0.0)          # bias + ReLU

    # Layers 2+3 fused: single (TB,256)@(256,2) MXU matmul with f32 accumulate.
    out = jnp.dot(h1, w23_ref[...], preferred_element_type=jnp.float32) + b23_ref[...]

    # TODO(synk): for very large batch a transposed (2, TB) lane-dense store
    # (transpose back in the wrapper) avoids masked vst; negligible here.
    o_ref[...] = out.astype(o_ref.dtype)


def _round_up(n, m):
    return ((n + m - 1) // m) * m


def mlp_forward(x, w1, b1, w2, b2, w3, b3, *, tb=128):
    """Forward of: Linear(3,256) -> ReLU -> Linear(256,64) -> Linear(64,2)."""
    # Algebraic fusion of the two activation-free linears: one matmul instead
    # of two inside the kernel (mathematically identical up to fp rounding).
    w23 = jnp.dot(w2, w3, preferred_element_type=jnp.float32)        # (256, 2)
    b23 = jnp.dot(b2, w3, preferred_element_type=jnp.float32) + b3   # (1, 2)

    B = x.shape[0]
    d_in = w1.shape[0]       # 3
    d_hid = w1.shape[1]      # 256
    d_out = w23.shape[1]     # 2

    # Batch tile: multiple of 8 sublanes, capped at `tb` (128 keeps the
    # (TB,256) f32 intermediate at ~32 vregs and fits trivially in VMEM,
    # including v7x's smaller 64 MiB / 32 MiB-scoped budget).
    TB = min(tb, _round_up(B, 8))
    Bp = _round_up(B, TB)
    if Bp != B:
        x = jnp.pad(x, ((0, Bp - B), (0, 0)))

    grid = (Bp // TB,)
    const = lambda i: (0, 0)             # weights/biases resident across steps

    flops = 2 * Bp * (d_in * d_hid + d_hid * d_out)
    bytes_accessed = 4 * (Bp * d_in + Bp * d_out
                          + d_in * d_hid + d_hid + d_hid * d_out + d_out)

    out = pl.pallas_call(
        mlp_kernel,
        out_shape=jax.ShapeDtypeStruct((Bp, d_out), jnp.float32),
        grid=grid,
        in_specs=[
            pl.BlockSpec((TB, d_in), lambda i: (i, 0)),    # x: tiled over batch
            pl.BlockSpec((d_in, d_hid), const),            # w1 (VMEM-resident)
            pl.BlockSpec((1, d_hid), const),               # b1
            pl.BlockSpec((d_hid, d_out), const),           # w23 (fused w2@w3)
            pl.BlockSpec((1, d_out), const),               # b23 (fused b2@w3+b3)
        ],
        out_specs=pl.BlockSpec((TB, d_out), lambda i: (i, 0)),
        compiler_params=pltpu.CompilerParams(
            # batch axis is embarrassingly parallel -> shard across the 2 TCs on v7x
            dimension_semantics=("parallel",),
            vmem_limit_bytes=32 * 1024 * 1024,
        ),
        cost_estimate=pl.CostEstimate(
            flops=flops, transcendentals=0, bytes_accessed=bytes_accessed),
    )(x, w1, b1, w23, b23)

    return out[:B] if Bp != B else out


def init_params(key):
    # Deterministic init mimicking PyTorch Linear default (uniform +/- 1/sqrt(fan_in)).
    def linear(key, fan_in, fan_out):
        kw, kb = jax.random.split(key)
        bound = 1.0 / jnp.sqrt(fan_in)
        w = jax.random.uniform(kw, (fan_in, fan_out), jnp.float32, -bound, bound)
        b = jax.random.uniform(kb, (1, fan_out), jnp.float32, -bound, bound)
        return w, b

    k1, k2, k3 = jax.random.split(key, 3)
    w1, b1 = linear(k1, 3, 256)
    w2, b2 = linear(k2, 256, 64)
    w3, b3 = linear(k3, 64, 2)
    return w1, b1, w2, b2, w3, b3


def _reference(x, w1, b1, w2, b2, w3, b3):
    h = jnp.maximum(x @ w1 + b1, 0.0)
    h = h @ w2 + b2
    return h @ w3 + b3


if __name__ == "__main__":
    key = jax.random.PRNGKey(0)
    k_in, k_in2, k_params = jax.random.split(key, 3)
    params = init_params(k_params)

    # Small shape (matches the toy usage).
    batch = 8
    x = jax.random.normal(k_in, (batch, 3), dtype=jnp.float32)
    out = mlp_forward(x, *params)
    jax.block_until_ready(out)
    assert out.shape == (batch, 2)
    assert jnp.allclose(out, _reference(x, *params), atol=1e-4, rtol=1e-4)

    # Larger, non-multiple-of-tile batch to exercise the grid + padding path.
    batch2 = 300
    x2 = jax.random.normal(k_in2, (batch2, 3), dtype=jnp.float32)
    out2 = mlp_forward(x2, *params)
    jax.block_until_ready(out2)
    assert out2.shape == (batch2, 2)
    assert jnp.allclose(out2, _reference(x2, *params), atol=1e-4, rtol=1e-4)

    print("KERNEL_OK")
</pallas_src>

<mosaic_0001>
module attributes {stable_mosaic.version = 11 : i64} {
  func.func @mlp_kernel(%arg0: i32, %arg1: memref<8x3xf32, #tpu.memory_space<vmem>>, %arg2: memref<3x256xf32, #tpu.memory_space<vmem>>, %arg3: memref<1x256xf32, #tpu.memory_space<vmem>>, %arg4: memref<256x2xf32, #tpu.memory_space<vmem>>, %arg5: memref<1x2xf32, #tpu.memory_space<vmem>>, %arg6: memref<8x2xf32, #tpu.memory_space<vmem>>) attributes {dimension_semantics = [#tpu.dimension_semantics<parallel>], iteration_bounds = array<i64: 1>, scalar_prefetch = 0 : i64, scratch_operands = 0 : i64, tpu.core_type = #tpu.core_type<tc>, window_params = [{transform_indices = @transform_0, window_bounds = array<i64: 8, 3>}, {pipeline_mode = #tpu.pipeline_mode<synchronous>, transform_indices = @transform_1, window_bounds = array<i64: 3, 256>}, {pipeline_mode = #tpu.pipeline_mode<synchronous>, transform_indices = @transform_2, window_bounds = array<i64: 1, 256>}, {pipeline_mode = #tpu.pipeline_mode<synchronous>, transform_indices = @transform_3, window_bounds = array<i64: 256, 2>}, {pipeline_mode = #tpu.pipeline_mode<synchronous>, transform_indices = @transform_4, window_bounds = array<i64: 1, 2>}, {transform_indices = @transform_5, window_bounds = array<i64: 8, 2>}]} {
    %c0 = arith.constant 0 : index
    %c0_0 = arith.constant 0 : index
    %0 = vector.load %arg1[%c0, %c0_0] : memref<8x3xf32, #tpu.memory_space<vmem>>, vector<8x3xf32>
    %c0_1 = arith.constant 0 : index
    %c0_2 = arith.constant 0 : index
    %1 = vector.load %arg2[%c0_1, %c0_2] : memref<3x256xf32, #tpu.memory_space<vmem>>, vector<3x256xf32>
    %2 = vector.extract_strided_slice %0 {offsets = [0, 0], sizes = [8, 1], strides = [1, 1]} : vector<8x3xf32> to vector<8x1xf32>
    %3 = vector.extract_strided_slice %1 {offsets = [0, 0], sizes = [1, 256], strides = [1, 1]} : vector<3x256xf32> to vector<1x256xf32>
    %4 = vector.broadcast %2 : vector<8x1xf32> to vector<8x256xf32>
    %5 = vector.broadcast %3 : vector<1x256xf32> to vector<8x256xf32>
    %6 = arith.mulf %4, %5 : vector<8x256xf32>
    %7 = vector.extract_strided_slice %0 {offsets = [0, 1], sizes = [8, 1], strides = [1, 1]} : vector<8x3xf32> to vector<8x1xf32>
    %8 = vector.extract_strided_slice %1 {offsets = [1, 0], sizes = [1, 256], strides = [1, 1]} : vector<3x256xf32> to vector<1x256xf32>
    %9 = vector.broadcast %7 : vector<8x1xf32> to vector<8x256xf32>
    %10 = vector.broadcast %8 : vector<1x256xf32> to vector<8x256xf32>
    %11 = arith.mulf %9, %10 : vector<8x256xf32>
    %12 = arith.addf %6, %11 : vector<8x256xf32>
    %13 = vector.extract_strided_slice %0 {offsets = [0, 2], sizes = [8, 1], strides = [1, 1]} : vector<8x3xf32> to vector<8x1xf32>
    %14 = vector.extract_strided_slice %1 {offsets = [2, 0], sizes = [1, 256], strides = [1, 1]} : vector<3x256xf32> to vector<1x256xf32>
    %15 = vector.broadcast %13 : vector<8x1xf32> to vector<8x256xf32>
    %16 = vector.broadcast %14 : vector<1x256xf32> to vector<8x256xf32>
    %17 = arith.mulf %15, %16 : vector<8x256xf32>
    %18 = arith.addf %12, %17 : vector<8x256xf32>
    %c0_3 = arith.constant 0 : index
    %c0_4 = arith.constant 0 : index
    %19 = vector.load %arg3[%c0_3, %c0_4] : memref<1x256xf32, #tpu.memory_space<vmem>>, vector<1x256xf32>
    %20 = vector.broadcast %19 : vector<1x256xf32> to vector<8x256xf32>
    %21 = arith.addf %18, %20 : vector<8x256xf32>
    %cst = arith.constant 0.000000e+00 : f32
    %22 = vector.broadcast %cst : f32 to vector<8x256xf32>
    %23 = arith.maximumf %21, %22 : vector<8x256xf32>
    %c0_5 = arith.constant 0 : index
    %c0_6 = arith.constant 0 : index
    %24 = vector.load %arg4[%c0_5, %c0_6] : memref<256x2xf32, #tpu.memory_space<vmem>>, vector<256x2xf32>
    %cst_7 = arith.constant dense<0.000000e+00> : vector<8x2xf32>
    %25 = tpu.matmul %23, %24, %cst_7 {dimension_numbers = #tpu.dot_dimension_numbers<[1], [0], [0], [1], [0, 0, 1, 1], [], []>} : vector<8x256xf32>, vector<256x2xf32>, vector<8x2xf32> -> vector<8x2xf32>
    %c0_8 = arith.constant 0 : index
    %c0_9 = arith.constant 0 : index
    %26 = vector.load %arg5[%c0_8, %c0_9] : memref<1x2xf32, #tpu.memory_space<vmem>>, vector<1x2xf32>
    %27 = vector.broadcast %26 : vector<1x2xf32> to vector<8x2xf32>
    %28 = arith.addf %25, %27 : vector<8x2xf32>
    %c0_10 = arith.constant 0 : index
    %c0_11 = arith.constant 0 : index
    %29 = vector.load %arg6[%c0_10, %c0_11] : memref<8x2xf32, #tpu.memory_space<vmem>>, vector<8x2xf32>
    tpu.vector_store %arg6[%c0_10, %c0_11], %28 {strides = array<i32>} : memref<8x2xf32, #tpu.memory_space<vmem>>, vector<8x2xf32>,
    return
  }
  func.func @transform_0(%arg0: i32) -> (i32, i32) {
    %c0_i32 = arith.constant 0 : i32
    %c0_i32_0 = arith.constant 0 : i32
    return %arg0, %c0_i32 : i32, i32
  }
  func.func @transform_1(%arg0: i32) -> (i32, i32) {
    %c0_i32 = arith.constant 0 : i32
    %c0_i32_0 = arith.constant 0 : i32
    %c0_i32_1 = arith.constant 0 : i32
    return %c0_i32, %c0_i32_0 : i32, i32
  }
  func.func @transform_2(%arg0: i32) -> (i32, i32) {
    %c0_i32 = arith.constant 0 : i32
    %c0_i32_0 = arith.constant 0 : i32
    %c0_i32_1 = arith.constant 0 : i32
    return %c0_i32, %c0_i32_0 : i32, i32
  }
  func.func @transform_3(%arg0: i32) -> (i32, i32) {
    %c0_i32 = arith.constant 0 : i32
    %c0_i32_0 = arith.constant 0 : i32
    %c0_i32_1 = arith.constant 0 : i32
    return %c0_i32, %c0_i32_0 : i32, i32
  }
  func.func @transform_4(%arg0: i32) -> (i32, i32) {
    %c0_i32 = arith.constant 0 : i32
    %c0_i32_0 = arith.constant 0 : i32
    %c0_i32_1 = arith.constant 0 : i32
    return %c0_i32, %c0_i32_0 : i32, i32
  }
  func.func @transform_5(%arg0: i32) -> (i32, i32) {
    %c0_i32 = arith.constant 0 : i32
    %c0_i32_0 = arith.constant 0 : i32
    return %arg0, %c0_i32 : i32, i32
  }
}

</mosaic_0001>

<bundles_post_ra>
// kernel: tpu_custom_call.1
= control target key start
LH: loop header
LB: loop body
LE: loop exit
PB: predicated region body
PF: predicated region fallthrough
CT: control target
= control target key end

     0   :  { %v164_v0 = vmov 0   ;;  %v165_v2 = vmov 2   ;;  %v166_v13 = vmov 1   ;;  %vm150_vm0 = vcmask 15360   ;;  %s308_s0 = inlined_call_operand.vmem [shape: f32[8,3], index: 0, kind: input, shape index: {}]   ;;  %s309_s3 = inlined_call_operand.vmem [shape: f32[256,2], index: 3, kind: input, shape index: {}]   ;;  %s310_s4 = inlined_call_operand.vmem [shape: f32[1,2], index: 4, kind: input, shape index: {}]   ;;  %s311_s1 = inlined_call_operand.vmem [shape: f32[3,256], index: 1, kind: input, shape index: {}]   ;;  %s312_s2 = inlined_call_operand.vmem [shape: f32[1,256], index: 2, kind: input, shape index: {}]   ;;  %s313_s5 = inlined_call_operand.vmem [shape: f32[8,2], index: 5, kind: output, shape index: {}]  }
   0x1   :  { %159 = vset.pattern.permute.xlu0 %v164_v0  ;;  %v20_v1 = vld [vmem:[%s308_s0] sm:$0xff]  ;;  %161 = vset.pattern.permute.xlu1 %v165_v2  ;;  %v89_v3 = vld [vmem:[%s309_s3 + $0x78] sm:$0xff]  ;;  %v88_v5 = vld [vmem:[%s309_s3 + $0x70] sm:$0xff] }
   0x2   :  { %v105_v4 = vld [vmem:[%s309_s3 + $0xf8] sm:$0xff]  ;;  %24 = vperm.xlu0 %159, %v20_v1   ;;  %51 = vperm.xlu1 %161, %v20_v1   ;;  %v104_v6 = vld [vmem:[%s309_s3 + $0xf0] sm:$0xff]  ;;  %v87_v7 = vld [vmem:[%s309_s3 + $0x68] sm:$0xff] }
   0x3   :  { %110 = vmatpush.msra.mxu0 %v89_v3  ;;  %130 = vmatpush.msra.mxu1 %v105_v4  ;;  %v103_v8 = vld [vmem:[%s309_s3 + $0xe8] sm:$0xff]  ;;  %v86_v9 = vld [vmem:[%s309_s3 + $0x60] sm:$0xff]  ;;  %v85_v11 = vld [vmem:[%s309_s3 + $0x58] sm:$0xff] }
   0x4   :  { %v102_v10 = vld [vmem:[%s309_s3 + $0xe0] sm:$0xff]  ;;  %v101_v12 = vld [vmem:[%s309_s3 + $0xd8] sm:$0xff]  ;;  %v84_v14 = vld [vmem:[%s309_s3 + $0x50] sm:$0xff] }
   0x5   :  { %111 = vmatpush.msra.mxu0 %v88_v5  ;;  %131 = vmatpush.msra.mxu1 %v104_v6  ;;  %v100_v15 = vld [vmem:[%s309_s3 + $0xd0] sm:$0xff]  ;;  %v83_v16 = vld [vmem:[%s309_s3 + $0x48] sm:$0xff]  ;;  %v82_v18 = vld [vmem:[%s309_s3 + $0x40] sm:$0xff] }
   0x6   :  { %v99_v17 = vld [vmem:[%s309_s3 + $0xc8] sm:$0xff]  ;;  %v98_v19 = vld [vmem:[%s309_s3 + $0xc0] sm:$0xff]  ;;  %v81_v20 = vld [vmem:[%s309_s3 + $0x38] sm:$0xff] }
   0x7   :  { %112 = vmatpush.msra.mxu0 %v87_v7  ;;  %132 = vmatpush.msra.mxu1 %v103_v8  ;;  %v97_v21 = vld [vmem:[%s309_s3 + $0xb8] sm:$0xff]  ;;  %v80_v22 = vld [vmem:[%s309_s3 + $0x30] sm:$0xff]  ;;  %v79_v24 = vld [vmem:[%s309_s3 + $0x28] sm:$0xff] }
   0x8   :  { %v96_v23 = vld [vmem:[%s309_s3 + $0xb0] sm:$0xff]  ;;  %v95_v25 = vld [vmem:[%s309_s3 + $0xa8] sm:$0xff]  ;;  %v78_v26 = vld [vmem:[%s309_s3 + $0x20] sm:$0xff] }
   0x9   :  { %113 = vmatpush.msra.mxu0 %v86_v9  ;;  %133 = vmatpush.msra.mxu1 %v102_v10  ;;  %v94_v27 = vld [vmem:[%s309_s3 + $0xa0] sm:$0xff]  ;;  %v77_v28 = vld [vmem:[%s309_s3 + $0x18] sm:$0xff]  ;;  %v76_v30 = vld [vmem:[%s309_s3 + $0x10] sm:$0xff] }
   0xa   :  { %160 = vset.pattern.permute.xlu0 %v166_v13  ;;  %v93_v29 = vld [vmem:[%s309_s3 + $0x98] sm:$0xff]  ;;  %v92_v31 = vld [vmem:[%s309_s3 + $0x90] sm:$0xff]  ;;  %v75_v32 = vld [vmem:[%s309_s3 + $0x8] sm:$0xff] }
   0xb   :  { %37 = vperm.xlu0 %160, %v20_v1   ;;  %114 = vmatpush.msra.mxu0 %v85_v11  ;;  %v91_v33 = vld [vmem:[%s309_s3 + $0x88] sm:$0xff]  ;;  %v74_v34 = vld [vmem:[%s309_s3] sm:$0xff] }
   0xc   :  { %134 = vmatpush.msra.mxu1 %v101_v12  ;;  %v90_v35 = vld [vmem:[%s309_s3 + $0x80] sm:$0xff] }
   0xd   :  { %115 = vmatpush.msra.mxu0 %v84_v14  ;;  %v21_v36 = vld [vmem:[%s311_s1] sm:$0x77] }
   0xe   :  { %135 = vmatpush.msra.mxu1 %v100_v15  ;;  %v28_v38 = vperm.slane %v21_v36, 0  ;;  %v29_v39 = vperm.slane %v21_v36, 4  ;;  %v40_v40 = vperm.slane %v21_v36, 1  ;;  %v41_v41 = vperm.slane %v21_v36, 5  ;;  %v64_v54 = vld [vmem:[%s312_s2] sm:$0x3] }
   0xf   :  { %116 = vmatpush.msra.mxu0 %v83_v16  ;;  %v54_v42 = vperm.slane %v21_v36, 2  ;;  %v55_v43 = vperm.slane %v21_v36, 6  ;;  %v66_v61 = vperm.slane %v64_v54, 0  ;;  %v67_v62 = vperm.slane %v64_v54, 1  ;;  %v163_v5 = vld [vmem:[%s310_s4] ss:$0 sm:$0xff] }
  0x10   :  { %136 = vmatpush.msra.mxu1 %v99_v17  ;;  %v32_v44 = vperm.slane %v28_v38, 0  ;;  %v33_v45 = vperm.slane %v29_v39, 0  ;;  %v44_v46 = vperm.slane %v40_v40, 1  ;;  %v45_v47 = vperm.slane %v41_v41, 1 }
  0x11   :  { %117 = vmatpush.msra.mxu0 %v82_v18  ;;  %v58_v48 = vperm.slane %v54_v42, 2  ;;  %v59_v49 = vperm.slane %v55_v43, 2 }
  0x12   :  { %137 = vmatpush.msra.mxu1 %v98_v19 }
  0x13   :  { %162 = vset.pattern.permute.xlu0 %v165_v2  ;;  %118 = vmatpush.msra.mxu0 %v81_v20 }
  0x14   :  { %138 = vmatpush.msra.mxu1 %v97_v21 }
  0x15   :  { %119 = vmatpush.msra.mxu0 %v80_v22 }
  0x16   :  { %139 = vmatpush.msra.mxu1 %v96_v23 }
  0x17   :  { %120 = vmatpush.msra.mxu0 %v79_v24 }
  0x18   :  { %140 = vmatpush.msra.mxu1 %v95_v25 }
  0x19   :  { %121 = vmatpush.msra.mxu0 %v78_v26 }
  0x1a   :  { %141 = vmatpush.msra.mxu1 %v94_v27 }
  0x1b   :  { %122 = vmatpush.msra.mxu0 %v77_v28 }
  0x1c   :  { %142 = vmatpush.msra.mxu1 %v93_v29 }
  0x1d   :  { %123 = vmatpush.msra.mxu0 %v76_v30 }
  0x1e   :  { %143 = vmatpush.msra.mxu1 %v92_v31 }
  0x1f   :  { %124 = vmatpush.msra.mxu0 %v75_v32 }
  0x20   :  { %144 = vmatpush.msra.mxu1 %v91_v33 }
  0x21   :  { %125 = vmatpush.msra.mxu0 %v74_v34 }
  0x22   :  { %145 = vmatpush.msra.mxu1 %v90_v35 }
  0x74   :  { %v25_v37 = vpop.permute.xlu0 %24  ;;  %v52_v50 = vpop.permute.xlu1 %51 }
  0x75   :  { %v34_v51 = vmul.f32 %v32_v44, %v25_v37  ;;  %v35_v52 = vmul.f32 %v33_v45, %v25_v37  ;;  %v60_v57 = vmul.f32 %v58_v48, %v52_v50  ;;  %v61_v58 = vmul.f32 %v59_v49, %v52_v50 }
  0x7d   :  { %v38_v53 = vpop.permute.xlu0 %37 }
  0x7e   :  { %v46_v55 = vmul.f32 %v44_v46, %v38_v53  ;;  %v47_v56 = vmul.f32 %v45_v47, %v38_v53 }
  0x80   :  { %v48_v59 = vadd.f32 %v46_v55, %v34_v51  ;;  %v49_v60 = vadd.f32 %v47_v56, %v35_v52 }
  0x82   :  { %v62_v63 = vadd.f32 %v60_v57, %v48_v59  ;;  %v63_v0 = vadd.f32 %v61_v58, %v49_v60 }
  0x84   :  { %v70_v1 = vadd.f32 %v66_v61, %v62_v63  ;;  %v71_v2 = vadd.f32 %v67_v62, %v63_v0 }
  0x86   :  { %v72_v3 = vmax.f32 %v70_v1, 0.0  ;;  %v73_v4 = vmax.f32 %v71_v2, 0.0 }
  0x88   :  { %126 = vmatmul.f32.vlgmr.msra.gmra.mxu0 %v72_v3  ;;  %146 = vmatmul.f32.vlgmr.msra.gmra.mxu1 %v73_v4 }
 0x105   :  { %v127_v6 = vpop.f32.mrf.mxu0  ;;  %v147_v8 = vpop.f32.mrf.mxu1 }
 0x106   :  { %v128_v7 = vadd.f32 %v163_v5, %v127_v6 }
 0x108   :  { %v148_v9 = vadd.f32 %v147_v8, %v128_v7 }
 0x10a   :  { %151 = vst.msk [vmem:[%s313_s5] sm:$0xff] %vm150_vm0, %v148_v9 }

</bundles_post_ra>
